<compile_context>
chip_gen: v5e
topology: v5e:2x2
jax: 0.10.0
libtpu: 0.0.40
codegen_flags: <defaults>
</compile_context>

<pallas_src>
import numpy as np
import jax
import jax.numpy as jnp
from jax.experimental import pallas as pl
from jax.experimental.pallas import tpu as pltpu


# ----------------------------------------------------------------------------
# TPU-generation-dependent tiling knobs
# ----------------------------------------------------------------------------
def _tpu_generation():
    try:
        kind = jax.devices()[0].device_kind.lower()
    except Exception:
        return "unknown"
    if "v7" in kind or "7x" in kind:
        return "v7x"
    if "v6" in kind:
        return "v6e"
    if "v5" in kind and ("lite" in kind or "v5e" in kind):
        return "v5e"
    return "other"


_GEN = _tpu_generation()
# ~block bytes per input ref: 4 MiB on v6e/v7x (amortize ~0.35 us/step), 2 MiB
# on v5e / unknown (16 MiB default scoped VMEM, ~820 GB/s HBM).
_BLOCK_BYTES = {"v7x": 4 << 20, "v6e": 4 << 20, "v5e": 2 << 20}.get(_GEN, 2 << 20)
# Deeper input buffering only on v7x (3.2 TB/s HBM); default (2) elsewhere.
_IN_BUF_DEPTH = 3 if _GEN == "v7x" else 2
# Scoped-VMEM cap with headroom: v7x has 64 MiB physical/TC, others 128 MiB.
_VMEM_CAP = (48 << 20) if _GEN == "v7x" else (100 << 20)
# Above this per-(B,C) volume the fused cls kernel falls back to the 3-pass path.
_MAX_FUSED_BLOCK_BYTES = 8 << 20


def _round_up(n, m):
    return ((n + m - 1) // m) * m


def _vmem_limit_bytes(working_bytes):
    want = int(working_bytes) + (8 << 20)
    return int(min(max(want, 32 << 20), _VMEM_CAP))


def _tile_spec(block_shape, index_map, buffer_depth=2):
    """BlockSpec with optional deeper multi-buffering (v7x), guarded so jax
    versions without pipeline_mode / pl.Buffered still work."""
    if buffer_depth > 2 and hasattr(pl, "Buffered"):
        try:
            return pl.BlockSpec(block_shape, index_map,
                                pipeline_mode=pl.Buffered(buffer_depth))
        except TypeError:
            pass
    return pl.BlockSpec(block_shape, index_map)


_SMEM_SPEC = pl.BlockSpec(memory_space=pltpu.MemorySpace.SMEM)


# ----------------------------------------------------------------------------
# Pallas kernels: out = alpha * x  and  out = alpha * x + beta * y
# ----------------------------------------------------------------------------
def _scale_kernel(a_ref, x_ref, o_ref):
    o_ref[...] = (a_ref[0] * x_ref[...].astype(jnp.float32)).astype(o_ref.dtype)


def _scale_add_kernel(a_ref, b_ref, x_ref, y_ref, o_ref):
    x = x_ref[...].astype(jnp.float32)
    y = y_ref[...].astype(jnp.float32)
    o_ref[...] = (a_ref[0] * x + b_ref[0] * y).astype(o_ref.dtype)


_LANE_CHOICES = (2048, 1024, 512, 256, 128)


def _pallas_affine(x, alpha, beta=None, y=None):
    """alpha * x (+ beta * y) elementwise on TPU via Pallas.

    Flattens to the widest lane-dense (rows, lanes) view that divides the
    element count (no pad/slice copies on any shape this module produces),
    tiles rows at a generation-tuned ~2-4 MiB per input block with a ragged
    (masked) last block, and keeps the grid >= 2 so both v7x TensorCores get
    work.  alpha/beta ride in SMEM as (1,) scalars; cast + scale happen on the
    VMEM tile.
    """
    orig_shape = x.shape
    dtype = x.dtype
    total = int(np.prod(orig_shape))
    itemsize = np.dtype(dtype).itemsize

    lanes = next((l for l in _LANE_CHOICES if total % l == 0), None)
    pad = 0
    if lanes is None:
        # TODO(synk): ragged totals (never produced by this module) still take
        # a pad+slice round trip; a masked 1-D edge block would avoid it.
        lanes = 128
        pad = (-total) % lanes
    rows = (total + pad) // lanes

    if rows <= 8:
        tile_rows = rows
    else:
        tile_rows = max(8, (_BLOCK_BYTES // (lanes * itemsize)) // 8 * 8)
        tile_rows = min(tile_rows, _round_up(pl.cdiv(rows, 2), 8))   # grid >= 2
    grid = pl.cdiv(rows, tile_rows)

    def prep(a):
        flat = jnp.ravel(a)
        if pad:
            flat = jnp.pad(flat, (0, pad))
        return flat.reshape(rows, lanes)

    in_tile = _tile_spec((tile_rows, lanes), lambda i: (i, 0), _IN_BUF_DEPTH)
    out_tile = pl.BlockSpec((tile_rows, lanes), lambda i: (i, 0))
    a32 = jnp.asarray(alpha, jnp.float32).reshape((1,))

    n_in = 1 if y is None else 2
    working = tile_rows * lanes * itemsize * (n_in * _IN_BUF_DEPTH + 2)
    cparams = pltpu.CompilerParams(
        dimension_semantics=("parallel",),
        vmem_limit_bytes=_vmem_limit_bytes(working))

    if y is None:
        out = pl.pallas_call(
            _scale_kernel,
            out_shape=jax.ShapeDtypeStruct((rows, lanes), dtype),
            grid=(grid,),
            in_specs=[_SMEM_SPEC, in_tile],
            out_specs=out_tile,
            compiler_params=cparams,
        )(a32, prep(x))
    else:
        assert x.shape == y.shape, (x.shape, y.shape)
        b32 = jnp.asarray(beta, jnp.float32).reshape((1,))
        out = pl.pallas_call(
            _scale_add_kernel,
            out_shape=jax.ShapeDtypeStruct((rows, lanes), dtype),
            grid=(grid,),
            in_specs=[_SMEM_SPEC, _SMEM_SPEC, in_tile, in_tile],
            out_specs=out_tile,
            compiler_params=cparams,
        )(a32, b32, prep(x), prep(y))

    out_flat = out.reshape(-1)
    if pad:
        out_flat = out_flat[:total]
    return out_flat.reshape(orig_shape)


# ----------------------------------------------------------------------------
# Fused cls-path kernel:
#   out = alpha * cls everywhere, and over the paste window
#   out[:, d0:d1, h0:h1, :] = alpha * cls + beta * seg_pad
# (seg_pad is zero outside the real window along W / the H alignment margin,
#  so the result equals alpha*cls + beta*part2 everywhere.)
# ----------------------------------------------------------------------------
def _make_cls_window_kernel(d0, d1, h0, h1):
    def kernel(a_ref, b_ref, cls_ref, seg_ref, o_ref):
        alpha = a_ref[0]
        beta = b_ref[0]
        o_ref[...] = (alpha * cls_ref[...].astype(jnp.float32)).astype(o_ref.dtype)
        win = (alpha * cls_ref[:, d0:d1, h0:h1, :].astype(jnp.float32)
               + beta * seg_ref[...].astype(jnp.float32))
        o_ref[:, d0:d1, h0:h1, :] = win.astype(o_ref.dtype)
    return kernel


def _cls_fused(cls5, seg_win, alpha, beta, d0, h0, w0):
    """Single-pass input_cls: one read of output_cls_stem + one write of
    input_cls + one read of the (small) seg window.  No zero canvas, no
    full-tensor dynamic-update-slice paste."""
    B, C, D, H, W = cls5.shape
    _, _, dN, hN, wN = seg_win.shape
    N = B * C
    d1 = d0 + dN
    # Align the H window to sublane (8) boundaries and zero-pad the seg window
    # along H (to the aligned bounds) and W (to full width) so the kernel only
    # slices major / sublane-aligned dims and never the lane axis.
    h0a = (h0 // 8) * 8
    h1a = min(_round_up(h0 + hN, 8), H)
    seg_pad = jnp.pad(
        seg_win,
        ((0, 0), (0, 0), (0, 0),
         (h0 - h0a, h1a - (h0 + hN)),
         (w0, W - (w0 + wN)))).astype(cls5.dtype)

    cls4 = cls5.reshape(N, D, H, W)
    seg4 = seg_pad.reshape(N, dN, h1a - h0a, W)

    itemsize = np.dtype(cls5.dtype).itemsize
    cls_block = D * H * W * itemsize
    seg_block = dN * (h1a - h0a) * W * itemsize
    working = (_IN_BUF_DEPTH + 2) * cls_block + _IN_BUF_DEPTH * seg_block

    kernel = _make_cls_window_kernel(d0, d1, h0a, h1a)
    out = pl.pallas_call(
        kernel,
        out_shape=jax.ShapeDtypeStruct((N, D, H, W), cls5.dtype),
        grid=(N,),
        in_specs=[
            _SMEM_SPEC,
            _SMEM_SPEC,
            _tile_spec((1, D, H, W), lambda i: (i, 0, 0, 0), _IN_BUF_DEPTH),
            _tile_spec((1, dN, h1a - h0a, W), lambda i: (i, 0, 0, 0), _IN_BUF_DEPTH),
        ],
        out_specs=pl.BlockSpec((1, D, H, W), lambda i: (i, 0, 0, 0)),
        compiler_params=pltpu.CompilerParams(
            dimension_semantics=("parallel",),
            vmem_limit_bytes=_vmem_limit_bytes(working)),
    )(jnp.asarray(alpha, jnp.float32).reshape((1,)),
      jnp.asarray(beta, jnp.float32).reshape((1,)),
      cls4, seg4)
    return out.reshape(B, C, D, H, W)


# ----------------------------------------------------------------------------
# Glue: static-index gathers that prefer strided slices / repeats over
#       TPU lane-axis gathers.
# ----------------------------------------------------------------------------
def _gather_axis(x, idx, axis):
    idx = np.asarray(idx, dtype=np.int64)
    n_in = x.shape[axis]
    n = idx.size
    if n == 0:
        sl = [slice(None)] * x.ndim
        sl[axis] = slice(0, 0)
        return x[tuple(sl)]
    if n == n_in and np.array_equal(idx, np.arange(n_in)):
        return x                                             # identity
    # arithmetic progression (incl. single element) -> strided slice
    if n == 1 or (idx[1] > idx[0]
                  and np.array_equal(idx, idx[0] + (idx[1] - idx[0]) * np.arange(n))):
        step = int(idx[1] - idx[0]) if n > 1 else 1
        start = int(idx[0])
        sl = [slice(None)] * x.ndim
        sl[axis] = slice(start, start + step * (n - 1) + 1, step)
        return x[tuple(sl)]
    # pure integer upsample pattern floor(i/f) -> repeat (no gather)
    if n % n_in == 0 and np.array_equal(idx, np.repeat(np.arange(n_in), n // n_in)):
        return jnp.repeat(x, n // n_in, axis=axis)
    # General fallback: never gather on the lane (last) axis.
    if axis == x.ndim - 1:
        xm = jnp.moveaxis(x, axis, 0)
        xm = jnp.take(xm, jnp.asarray(idx), axis=0)
        return jnp.moveaxis(xm, 0, axis)
    return jnp.take(x, jnp.asarray(idx), axis=axis)


def nearest_interp_5d(x, out_d, out_h, out_w):
    """Exact equivalent of F.interpolate(mode='nearest') on 5-D NCDHW."""
    _, _, D, H, W = x.shape

    def nearest_idx(n_out, n_in):
        return np.minimum(np.floor(np.arange(n_out) * (n_in / n_out)),
                          n_in - 1).astype(np.int64)

    x = _gather_axis(x, nearest_idx(out_d, D), axis=2)
    x = _gather_axis(x, nearest_idx(out_h, H), axis=3)
    x = _gather_axis(x, nearest_idx(out_w, W), axis=4)
    return x


# ----------------------------------------------------------------------------
# task_inter.forward
# ----------------------------------------------------------------------------
def task_inter_forward(params, output_cls_stem, output_seg_stem,
                       crop_center, crop_size, split_num_cls, phase="Train"):
    B, C, Dc, Hc, Wc = output_cls_stem.shape
    cc = np.asarray(crop_center, dtype=np.float64).reshape(-1)   # (x, y, z, full_depth)
    cs = np.asarray(crop_size, dtype=np.float64).reshape(-1)     # (x, y, z)

    # ---- input_cls path: virtual (never materialized) 256x256 zero canvas ----
    full_depth = int(cc[3] / 2)
    x_lo = int(cc[0] / 2 - cs[0] / 4)
    x_hi = int(cc[0] / 2 + cs[0] / 4)
    y_lo = int(cc[1] / 2 - cs[1] / 4)
    y_hi = int(cc[1] / 2 + cs[1] / 4)
    z_hi_test = int(cc[2] / 2 + cs[2] / 4)
    if z_hi_test >= full_depth:
        z_lo = int(cc[2] / 2 - cs[2] / 4) - (z_hi_test - (full_depth - 1))
        z_hi = full_depth - 1
    else:
        z_lo = int(cc[2] / 2 - cs[2] / 4)
        z_hi = z_hi_test
    # TODO(synk): negative z_lo (torch wrap-around slicing) is not emulated.

    # Depth subsampling (np.int16 truncation, exactly as in the original).
    slice_width = (cc[3] - 1) / float(split_num_cls)
    crop_num = np.array([np.int16(slice_width * i)
                         for i in range(int(split_num_cls / 2))], dtype=np.int64)

    # Canvas-coordinate indices picked by the nearest (256,256)->(Hc,Wc) resize.
    canv_h = np.minimum(np.floor(np.arange(Hc) * (256.0 / Hc)), 255).astype(np.int64)
    canv_w = np.minimum(np.floor(np.arange(Wc) * (256.0 / Wc)), 255).astype(np.int64)

    d_sel = np.nonzero((crop_num >= z_lo) & (crop_num < z_hi))[0]
    h_sel = np.nonzero((canv_h >= x_lo) & (canv_h < x_hi))[0]
    w_sel = np.nonzero((canv_w >= y_lo) & (canv_w < y_hi))[0]
    have_window = bool(d_sel.size and h_sel.size and w_sel.size)

    seg_win = None
    if have_window:
        d0, d1 = int(d_sel[0]), int(d_sel[-1]) + 1
        h0, h1 = int(h_sel[0]), int(h_sel[-1]) + 1
        w0, w1 = int(w_sel[0]), int(w_sel[-1]) + 1
        seg_d = crop_num[d0:d1] - z_lo
        seg_h = canv_h[h0:h1] - x_lo
        seg_w = canv_w[w0:w1] - y_lo
        # Strided-slice / repeat gathers (never a lane-axis gather).
        seg_win = _gather_axis(output_seg_stem, seg_d, axis=2)
        seg_win = _gather_axis(seg_win, seg_h, axis=3)
        seg_win = _gather_axis(seg_win, seg_w, axis=4)

    per_bc_bytes = Dc * Hc * Wc * np.dtype(output_cls_stem.dtype).itemsize
    if have_window and per_bc_bytes <= _MAX_FUSED_BLOCK_BYTES:
        # Single fused pass over the whole cls tensor (+ beta_1*window add).
        input_cls = _cls_fused(output_cls_stem, seg_win,
                               params["alpha_1"], params["beta_1"], d0, h0, w0)
    else:
        # Outside the paste window part2 == 0, so input_cls = alpha_1*cls there.
        input_cls = _pallas_affine(output_cls_stem, params["alpha_1"])
        if have_window:
            # TODO(synk): very large per-(B,C) volumes fall back to the 3-pass
            # path (full-tensor paste); never hit at this module's shapes.
            cls_win = output_cls_stem[:, :, d0:d1, h0:h1, w0:w1]
            win_out = _pallas_affine(cls_win, params["alpha_1"],
                                     params["beta_1"], seg_win)
            input_cls = input_cls.at[:, :, d0:d1, h0:h1, w0:w1].set(win_out)

    # ---- input_seg path: crop of cls stem + nearest resize -------------------
    ratio_z = cc[3] / Dc
    ratio_x = 512.0 / Hc
    ratio_y = 512.0 / Wc
    if phase not in ("Train", "Test"):
        # The original module also fails (NameError) for unknown phases.
        raise NameError("phase must be 'Train' or 'Test'")
    k1 = np.ceil(cc[2] / ratio_z)      # Train and Test branches are identical
    k2 = np.ceil(np.ceil(cs[2] / ratio_z) / 2)
    delta_k1_subtraction = int(k1 - k2)
    delta_k1_plus = int(k1 + k2)
    if k2 == 0:
        delta_k1_plus = delta_k1_plus + 1
    if delta_k1_subtraction < 0:
        delta_k1_subtraction = 0
    if delta_k1_subtraction == 0:
        if k1 == 0:
            delta_k1_subtraction = 0
            delta_k1_plus = 1
    if delta_k1_plus > Dc - 1:
        delta_k1_subtraction = delta_k1_subtraction - (delta_k1_plus - Dc + 1)
        delta_k1_plus = Dc - 1

    xs_lo = int(cc[0] / ratio_x - cs[0] / ratio_x / 2)
    xs_hi = int(cc[0] / ratio_x + cs[0] / ratio_x / 2)
    ys_lo = int(cc[1] / ratio_y - cs[1] / ratio_y / 2)
    ys_hi = int(cc[1] / ratio_y + cs[1] / ratio_y / 2)

    input_seg_part2 = output_cls_stem[
        :, :, delta_k1_subtraction:delta_k1_plus, xs_lo:xs_hi, ys_lo:ys_hi]
    # TODO(synk): the nearest resample is still a (cheap, seg-sized) XLA
    # repeat/slice pass; fusing it into the scale_add kernel would save one
    # seg-sized HBM round trip.
    input_seg_part2 = nearest_interp_5d(
        input_seg_part2, int(cs[2] / 2), int(cs[0] / 2), int(cs[1] / 2))

    input_seg = _pallas_affine(output_seg_stem, params["alpha_2"],
                               params["beta_2"], input_seg_part2)

    return input_cls, input_seg


# ----------------------------------------------------------------------------
# Pure-numpy reference of the original torch forward (test only)
# ----------------------------------------------------------------------------
def _np_nearest_idx(n_out, n_in):
    return np.minimum(np.floor(np.arange(n_out) * (n_in / n_out)),
                      n_in - 1).astype(np.int64)


def _np_nearest_interp_5d(x, out_d, out_h, out_w):
    D, H, W = x.shape[2:]
    x = x[:, :, _np_nearest_idx(out_d, D)]
    x = x[:, :, :, _np_nearest_idx(out_h, H)]
    x = x[:, :, :, :, _np_nearest_idx(out_w, W)]
    return x


def _reference_forward_np(params, cls, seg, crop_center, crop_size,
                          split_num_cls, phase):
    cls = np.asarray(cls, np.float32)
    seg = np.asarray(seg, np.float32)
    cc = np.asarray(crop_center, np.float64).reshape(-1)
    cs = np.asarray(crop_size, np.float64).reshape(-1)
    B, C, Dc, Hc, Wc = cls.shape
    a1 = float(np.asarray(params["alpha_1"]).reshape(-1)[0])
    b1 = float(np.asarray(params["beta_1"]).reshape(-1)[0])
    a2 = float(np.asarray(params["alpha_2"]).reshape(-1)[0])
    b2 = float(np.asarray(params["beta_2"]).reshape(-1)[0])

    part2 = np.zeros((B, C, int(cc[3] / 2), 256, 256), np.float32)
    if int(cc[2] / 2 + cs[2] / 4) >= int(cc[3] / 2):
        part2[:, :,
              int(cc[2] / 2 - cs[2] / 4) - (int(cc[2] / 2 + cs[2] / 4) - (int(cc[3] / 2) - 1)):int(cc[3] / 2) - 1,
              int(cc[0] / 2 - cs[0] / 4):int(cc[0] / 2 + cs[0] / 4),
              int(cc[1] / 2 - cs[1] / 4):int(cc[1] / 2 + cs[1] / 4)] = seg
    else:
        part2[:, :,
              int(cc[2] / 2 - cs[2] / 4):int(cc[2] / 2 + cs[2] / 4),
              int(cc[0] / 2 - cs[0] / 4):int(cc[0] / 2 + cs[0] / 4),
              int(cc[1] / 2 - cs[1] / 4):int(cc[1] / 2 + cs[1] / 4)] = seg
    slice_width = (cc[3] - 1) / split_num_cls
    crop_num = np.array([np.int16(slice_width * i)
                         for i in range(int(split_num_cls / 2))])
    part2 = part2[:, :, crop_num, :, :]
    part2 = _np_nearest_interp_5d(part2, part2.shape[2],
                                  part2.shape[3] // 2, part2.shape[4] // 2)
    input_cls = a1 * cls + b1 * part2

    ratio_z = cc[3] / Dc
    ratio_x = 512.0 / Hc
    ratio_y = 512.0 / Wc
    k1 = np.ceil(cc[2] / ratio_z)
    k2 = np.ceil(np.ceil(cs[2] / ratio_z) / 2)
    dks = int(k1 - k2)
    dkp = int(k1 + k2)
    if k2 == 0:
        dkp += 1
    if dks < 0:
        dks = 0
    if dks == 0 and k1 == 0:
        dks = 0
        dkp = 1
    if dkp > Dc - 1:
        dks = dks - (dkp - Dc + 1)
        dkp = Dc - 1
    part2s = cls[:, :, dks:dkp,
                 int(cc[0] / ratio_x - cs[0] / ratio_x / 2):int(cc[0] / ratio_x + cs[0] / ratio_x / 2),
                 int(cc[1] / ratio_y - cs[1] / ratio_y / 2):int(cc[1] / ratio_y + cs[1] / ratio_y / 2)]
    part2s = _np_nearest_interp_5d(part2s, int(cs[2] / 2), int(cs[0] / 2), int(cs[1] / 2))
    input_seg = a2 * seg + b2 * part2s
    return input_cls, input_seg


# ----------------------------------------------------------------------------
# main
# ----------------------------------------------------------------------------
if __name__ == "__main__":
    key = jax.random.PRNGKey(0)
    kcls, kseg, kp = jax.random.split(key, 3)

    # Shapes consistent with the module's hard-coded 256/512 constants:
    # cls stem H=W must be 128 (=256/2); depth = split_num_cls/2.
    B, C = 2, 4
    D_cls, H_cls, W_cls = 8, 128, 128
    split_num_cls = 16
    crop_center = np.array([[128.0], [128.0], [32.0], [64.0]])   # (x, y, z, full_depth)
    crop_size = np.array([64.0, 64.0, 16.0])                     # (x, y, z)

    output_cls_stem = jax.random.normal(
        kcls, (B, C, D_cls, H_cls, W_cls), dtype=jnp.float32)
    output_seg_stem = jax.random.normal(
        kseg,
        (B, C, int(crop_size[2] // 2), int(crop_size[0] // 2), int(crop_size[1] // 2)),
        dtype=jnp.float32)

    # torch.nn.Parameter(torch.Tensor(1)) is uninitialized; init deterministically.
    pk = jax.random.split(kp, 4)
    params = {
        "alpha_1": jax.random.uniform(pk[0], (1,), jnp.float32),
        "beta_1": jax.random.uniform(pk[1], (1,), jnp.float32),
        "alpha_2": jax.random.uniform(pk[2], (1,), jnp.float32),
        "beta_2": jax.random.uniform(pk[3], (1,), jnp.float32),
    }

    # Pallas wrapper self-checks: ragged (pad fallback) and lane-dense paths.
    xt = jax.random.normal(jax.random.PRNGKey(1), (3, 5, 7), jnp.float32)
    yt = jax.random.normal(jax.random.PRNGKey(2), (3, 5, 7), jnp.float32)
    got = _pallas_affine(xt, jnp.float32(0.5), jnp.float32(-2.0), yt)
    assert np.allclose(np.asarray(got),
                       0.5 * np.asarray(xt) - 2.0 * np.asarray(yt), atol=1e-5)
    xt2 = jax.random.normal(jax.random.PRNGKey(3), (4, 16, 128), jnp.float32)
    got2 = _pallas_affine(xt2, jnp.float32(1.5))
    assert np.allclose(np.asarray(got2), 1.5 * np.asarray(xt2), atol=1e-5)

    input_cls, input_seg = task_inter_forward(
        params, output_cls_stem, output_seg_stem,
        crop_center, crop_size, split_num_cls, phase="Train")
    jax.block_until_ready((input_cls, input_seg))

    assert input_cls.shape == output_cls_stem.shape
    assert input_seg.shape == output_seg_stem.shape

    # Numerical check against a faithful numpy port of the torch forward.
    ref_cls, ref_seg = _reference_forward_np(
        params, output_cls_stem, output_seg_stem,
        crop_center, crop_size, split_num_cls, phase="Train")
    assert np.allclose(np.asarray(input_cls), ref_cls, rtol=1e-5, atol=1e-5), \
        float(np.abs(np.asarray(input_cls) - ref_cls).max())
    assert np.allclose(np.asarray(input_seg), ref_seg, rtol=1e-5, atol=1e-5), \
        float(np.abs(np.asarray(input_seg) - ref_seg).max())

    # TODO(synk): .cuda(device_ids[0]) device placement from the original module
    # has no meaning here (single-TPU script).
    print("KERNEL_OK")
</pallas_src>

<mosaic_0001>
module attributes {stable_mosaic.version = 11 : i64} {
  func.func @_scale_add_kernel(%arg0: i32, %arg1: memref<1xf32, #tpu.memory_space<smem>>, %arg2: memref<1xf32, #tpu.memory_space<smem>>, %arg3: memref<1x128xf32, #tpu.memory_space<vmem>>, %arg4: memref<1x128xf32, #tpu.memory_space<vmem>>, %arg5: memref<1x128xf32, #tpu.memory_space<vmem>>) attributes {dimension_semantics = [#tpu.dimension_semantics<parallel>], iteration_bounds = array<i64: 1>, scalar_prefetch = 0 : i64, scratch_operands = 0 : i64, tpu.core_type = #tpu.core_type<tc>, window_params = [{transform_indices = @transform_0, window_bounds = array<i64: 1>}, {transform_indices = @transform_1, window_bounds = array<i64: 1>}, {transform_indices = @transform_2, window_bounds = array<i64: 1, 128>}, {transform_indices = @transform_3, window_bounds = array<i64: 1, 128>}, {transform_indices = @transform_4, window_bounds = array<i64: 1, 128>}]} {
    %c0 = arith.constant 0 : index
    %c0_0 = arith.constant 0 : index
    %0 = vector.load %arg3[%c0, %c0_0] : memref<1x128xf32, #tpu.memory_space<vmem>>, vector<1x128xf32>
    %c0_1 = arith.constant 0 : index
    %c0_2 = arith.constant 0 : index
    %1 = vector.load %arg4[%c0_1, %c0_2] : memref<1x128xf32, #tpu.memory_space<vmem>>, vector<1x128xf32>
    %c0_3 = arith.constant 0 : index
    %2 = memref.load %arg1[%c0_3] : memref<1xf32, #tpu.memory_space<smem>>
    %3 = vector.broadcast %2 : f32 to vector<1x128xf32>
    %4 = arith.mulf %3, %0 : vector<1x128xf32>
    %c0_4 = arith.constant 0 : index
    %5 = memref.load %arg2[%c0_4] : memref<1xf32, #tpu.memory_space<smem>>
    %6 = vector.broadcast %5 : f32 to vector<1x128xf32>
    %7 = arith.mulf %6, %1 : vector<1x128xf32>
    %8 = arith.addf %4, %7 : vector<1x128xf32>
    %c0_5 = arith.constant 0 : index
    %c0_6 = arith.constant 0 : index
    %9 = vector.load %arg5[%c0_5, %c0_6] : memref<1x128xf32, #tpu.memory_space<vmem>>, vector<1x128xf32>
    tpu.vector_store %arg5[%c0_5, %c0_6], %8 {strides = array<i32>} : memref<1x128xf32, #tpu.memory_space<vmem>>, vector<1x128xf32>,
    return
  }
  func.func @transform_0(%arg0: i32) -> i32 {
    %c0_i32 = arith.constant 0 : i32
    %c0_i32_0 = arith.constant 0 : i32
    return %c0_i32 : i32
  }
  func.func @transform_1(%arg0: i32) -> i32 {
    %c0_i32 = arith.constant 0 : i32
    %c0_i32_0 = arith.constant 0 : i32
    return %c0_i32 : i32
  }
  func.func @transform_2(%arg0: i32) -> (i32, i32) {
    %c0_i32 = arith.constant 0 : i32
    %c0_i32_0 = arith.constant 0 : i32
    return %arg0, %c0_i32 : i32, i32
  }
  func.func @transform_3(%arg0: i32) -> (i32, i32) {
    %c0_i32 = arith.constant 0 : i32
    %c0_i32_0 = arith.constant 0 : i32
    return %arg0, %c0_i32 : i32, i32
  }
  func.func @transform_4(%arg0: i32) -> (i32, i32) {
    %c0_i32 = arith.constant 0 : i32
    %c0_i32_0 = arith.constant 0 : i32
    return %arg0, %c0_i32 : i32, i32
  }
}

</mosaic_0001>

<bundles_post_ra>
// kernel: tpu_custom_call.1
= control target key start
LH: loop header
LB: loop body
LE: loop exit
PB: predicated region body
PF: predicated region fallthrough
CT: control target
= control target key end

     0   :  { %s114_s0 = inlined_call_operand.<no memory space> [shape: f32[1], index: 0, kind: input, shape index: {}]   ;;  %s115_s1 = inlined_call_operand.<no memory space> [shape: f32[1], index: 1, kind: input, shape index: {}]   ;;  %s116_s2 = inlined_call_operand.vmem [shape: f32[1,128], index: 2, kind: input, shape index: {}]   ;;  %s117_s3 = inlined_call_operand.vmem [shape: f32[1,128], index: 3, kind: input, shape index: {}]   ;;  %s118_s4 = inlined_call_operand.hbm [shape: f32[1,128], index: 4, kind: output, shape index: {}]  }
   0x1   :  { %v20_v0 = vld [vmem:[%s116_s2] sm:$0x1]  ;;  %v23_v2 = vstv %s114_s0  ;;  %v26_v3 = vstv %s115_s1  ;;  %s37_s25 = sshll.u32 %s118_s4, 4  ;;  %s38_s25 = int_to_ptr.hbm [resolvable:$true] %s37_s25 }
   0x2   :  { %v21_v1 = vld [vmem:[%s117_s3] sm:$0x1]  ;;  %v24_v4 = vmul.f32 %v23_v2, %v20_v0 }
   0x3   :  { %v27_v5 = vmul.f32 %v26_v3, %v21_v1 }
   0x4   :  { %11 = vsyncpa [#allocation5], 0  ;;  %s73_s2 = smov [#allocation4]  }
   0x5   :  { %s35_s26 = sshll.u32 %s73_s2, 4  ;;  %v28_v6 = vadd.f32 %v27_v5, %v24_v4  ;;  %s36_s26 = int_to_ptr.vmem [resolvable:$true] %s35_s26 }
   0x7   :  { %29 = vst [vmem:[#allocation4] sm:$0x1] %v28_v6 }
   0x8   :  { %40 = dma.vmem_to_hbm [thread:$0]  %s36_s26, 16, %s38_s25, [#allocation5]  }
   0x9   :  { %71 = dma.done.wait [#allocation5], 16  }
   0xa   :  { %72 = vsyncadd [#allocation5], 4294967280 }
   0xb   :  { %45 = vsyncpa [#allocation5], 1 }

</bundles_post_ra>
